<compile_context>
chip_gen: v5e
topology: v5e:2x2
jax: 0.10.0
libtpu: 0.0.40
codegen_flags: <defaults>
</compile_context>

<pallas_src>
import functools

import jax
import jax.numpy as jnp
from jax.experimental import pallas as pl
from jax.experimental.pallas import tpu as pltpu

ALPHA = 0.99
LANES = 128
SUBLANES = 8
NCORES = 2  # leading "parallel" axis: both TCs on v7x, no-op on 1-TC chips


def _iou_kernel(pred_ref, gt_ref, out_ref, *, rows, tile_rows, tiles_per_core,
                nblocks, alpha):
    c = pl.program_id(0)   # core / parallel axis
    i = pl.program_id(1)   # row-tile reduction axis ("arbitrary")

    @pl.when(i == 0)
    def _init():
        out_ref[...] = jnp.zeros_like(out_ref)

    logical_blk = c * tiles_per_core + i
    blk = jnp.minimum(logical_blk, nblocks - 1)      # matches clamp in index_map
    row0 = blk * tile_rows
    row_ids = row0 + jax.lax.broadcasted_iota(jnp.int32, (tile_rows, LANES), 0)
    # Mask (a) garbage rows of a partial last tile and (b) duplicated
    # (clamped) tiles when nblocks does not divide evenly across cores.
    valid = (row_ids < rows) & (logical_blk < nblocks)

    # Upcast per-tile (cheap, in-register); keeps HBM traffic at native dtype.
    p = pred_ref[...].astype(jnp.float32)
    g = gt_ref[...].astype(jnp.float32)
    mp = (p >= alpha) & valid
    mg = (g >= alpha) & valid

    inter = (mp & mg).astype(jnp.float32)            # mask_pred * mask_gt
    union = (mp | mg).astype(jnp.float32)            # clip(mask_pred + mask_gt, 0, 1)

    # (tile_rows,128) -> (8,128) via vreg-aligned reshape + vector adds (VPU only);
    # accumulate into the resident output block. Final reduce is in the wrapper.
    out_ref[0, 0] += inter.reshape(-1, SUBLANES, LANES).sum(axis=0)
    out_ref[0, 1] += union.reshape(-1, SUBLANES, LANES).sum(axis=0)


def iou_pallas(pred, gt, *, alpha=ALPHA, tile_rows=1024):
    assert pred.shape == gt.shape
    n = pred.size
    assert n > 0

    # Flatten without changing dtype; reshape of a contiguous array is free.
    pred_flat = pred.reshape(-1)
    gt_flat = gt.reshape(-1)

    rem = n % (SUBLANES * LANES)
    if rem:
        # Rare fallback: pad only to the next (8*128) boundary so the 2-D slab
        # has sublane-aligned rows. Zero padding is < alpha -> contributes 0.
        pad = SUBLANES * LANES - rem
        pred_flat = jnp.pad(pred_flat, (0, pad))
        gt_flat = jnp.pad(gt_flat, (0, pad))

    rows = pred_flat.size // LANES                   # multiple of 8
    pred2d = pred_flat.reshape(rows, LANES)
    gt2d = gt_flat.reshape(rows, LANES)

    tile_rows = min(tile_rows, rows)                 # both multiples of 8
    nblocks = pl.cdiv(rows, tile_rows)
    tiles_per_core = pl.cdiv(nblocks, NCORES)

    def in_map(c, i):
        # Clamp so we never ask for a block past the array; duplicated visits
        # are fully masked inside the kernel.
        return (jnp.minimum(c * tiles_per_core + i, nblocks - 1), 0)

    kernel = functools.partial(
        _iou_kernel, rows=rows, tile_rows=tile_rows,
        tiles_per_core=tiles_per_core, nblocks=nblocks, alpha=alpha)

    partials = pl.pallas_call(
        kernel,
        out_shape=jax.ShapeDtypeStruct((NCORES, 2, SUBLANES, LANES), jnp.float32),
        grid_spec=pltpu.PrefetchScalarGridSpec(
            num_scalar_prefetch=0,
            grid=(NCORES, tiles_per_core),
            in_specs=[
                pl.BlockSpec((tile_rows, LANES), in_map),
                pl.BlockSpec((tile_rows, LANES), in_map),
            ],
            out_specs=pl.BlockSpec((1, 2, SUBLANES, LANES),
                                   lambda c, i: (c, 0, 0, 0)),
        ),
        compiler_params=pltpu.CompilerParams(
            dimension_semantics=("parallel", "arbitrary")),
    )(pred2d, gt2d)

    inter = jnp.sum(partials[:, 0])
    union = jnp.sum(partials[:, 1])
    # Matches torch semantics: union == 0 -> nan.
    return inter / union


def iou_ref(pred, gt, alpha=ALPHA):
    mp = (pred >= alpha).astype(jnp.float32)
    mg = (gt >= alpha).astype(jnp.float32)
    return jnp.sum(mp * mg) / jnp.sum(jnp.clip(mp + mg, 0.0, 1.0))


if __name__ == "__main__":
    key = jax.random.PRNGKey(0)
    k1, k2, k3, k4 = jax.random.split(key, 4)

    # Primary check: small NCHW heat-map shaped input, 1024-aligned (no pad).
    shape = (2, 4, 16, 16)
    pred = jax.random.uniform(k1, shape, dtype=jnp.float32)
    gt = jax.random.uniform(k2, shape, dtype=jnp.float32)
    out = jax.block_until_ready(iou_pallas(pred, gt))
    ref = iou_ref(pred, gt)
    assert jnp.allclose(out, ref, atol=1e-6, equal_nan=True), (out, ref)

    # Secondary check: unaligned size + multiple row-tiles per core
    # (exercises the pad fallback, partial-tile masking and block clamping).
    shape2 = (1, 3, 30, 29)
    pred2 = jax.random.uniform(k3, shape2, dtype=jnp.float32)
    gt2 = jax.random.uniform(k4, shape2, dtype=jnp.float32)
    out2 = jax.block_until_ready(iou_pallas(pred2, gt2, tile_rows=8))
    ref2 = iou_ref(pred2, gt2)
    assert jnp.allclose(out2, ref2, atol=1e-6, equal_nan=True), (out2, ref2)

    print("KERNEL_OK")
</pallas_src>

<mosaic_0001>
module attributes {stable_mosaic.version = 11 : i64} {
  func.func @_iou_kernel(%arg0: i32, %arg1: i32, %arg2: memref<16x128xf32, #tpu.memory_space<vmem>>, %arg3: memref<16x128xf32, #tpu.memory_space<vmem>>, %arg4: memref<1x2x8x128xf32, #tpu.memory_space<vmem>>) attributes {dimension_semantics = [#tpu.dimension_semantics<parallel>, #tpu.dimension_semantics<arbitrary>], iteration_bounds = array<i64: 2, 1>, scalar_prefetch = 0 : i64, scratch_operands = 0 : i64, tpu.core_type = #tpu.core_type<tc>, window_params = [{transform_indices = @transform_0, window_bounds = array<i64: 16, 128>}, {transform_indices = @transform_1, window_bounds = array<i64: 16, 128>}, {transform_indices = @transform_2, window_bounds = array<i64: 1, 2, 8, 128>}]} {
    %c0_i32 = arith.constant 0 : i32
    %0 = arith.cmpi eq, %arg1, %c0_i32 : i32
    %1 = arith.extui %0 : i1 to i32
    %c0_i32_0 = arith.constant 0 : i32
    %2 = arith.cmpi ne, %1, %c0_i32_0 : i32
    scf.if %2 {
      %cst_25 = arith.constant 0.000000e+00 : f32
      %45 = vector.broadcast %cst_25 : f32 to vector<1x2x8x128xf32>
      %c0_26 = arith.constant 0 : index
      %c0_27 = arith.constant 0 : index
      %c0_28 = arith.constant 0 : index
      %c0_29 = arith.constant 0 : index
      %46 = vector.load %arg4[%c0_26, %c0_27, %c0_28, %c0_29] : memref<1x2x8x128xf32, #tpu.memory_space<vmem>>, vector<1x2x8x128xf32>
      tpu.vector_store %arg4[%c0_26, %c0_27, %c0_28, %c0_29], %45 {strides = array<i32>} : memref<1x2x8x128xf32, #tpu.memory_space<vmem>>, vector<1x2x8x128xf32>,
    } else {
    }
    %c1_i32 = arith.constant 1 : i32
    %3 = arith.muli %arg0, %c1_i32 : i32
    %4 = arith.addi %3, %arg1 : i32
    %c0_i32_1 = arith.constant 0 : i32
    %5 = arith.minsi %4, %c0_i32_1 : i32
    %c16_i32 = arith.constant 16 : i32
    %6 = arith.muli %5, %c16_i32 : i32
    %7 = tpu.iota {dimensions = array<i32: 0>} : vector<16x128xi32>
    %8 = vector.broadcast %6 : i32 to vector<16x128xi32>
    %9 = arith.addi %8, %7 : vector<16x128xi32>
    %c16_i32_2 = arith.constant 16 : i32
    %10 = vector.broadcast %c16_i32_2 : i32 to vector<16x128xi32>
    %11 = arith.cmpi slt, %9, %10 : vector<16x128xi32>
    %c1_i32_3 = arith.constant 1 : i32
    %12 = arith.cmpi slt, %4, %c1_i32_3 : i32
    %13 = vector.broadcast %12 : i1 to vector<16x128xi1>
    %14 = arith.andi %11, %13 : vector<16x128xi1>
    %c0 = arith.constant 0 : index
    %c0_4 = arith.constant 0 : index
    %15 = vector.load %arg2[%c0, %c0_4] : memref<16x128xf32, #tpu.memory_space<vmem>>, vector<16x128xf32>
    %c0_5 = arith.constant 0 : index
    %c0_6 = arith.constant 0 : index
    %16 = vector.load %arg3[%c0_5, %c0_6] : memref<16x128xf32, #tpu.memory_space<vmem>>, vector<16x128xf32>
    %cst = arith.constant 9.900000e-01 : f32
    %17 = vector.broadcast %cst : f32 to vector<16x128xf32>
    %18 = arith.cmpf oge, %15, %17 : vector<16x128xf32>
    %19 = arith.andi %18, %14 : vector<16x128xi1>
    %cst_7 = arith.constant 9.900000e-01 : f32
    %20 = vector.broadcast %cst_7 : f32 to vector<16x128xf32>
    %21 = arith.cmpf oge, %16, %20 : vector<16x128xf32>
    %22 = arith.andi %21, %14 : vector<16x128xi1>
    %23 = arith.andi %19, %22 : vector<16x128xi1>
    %24 = arith.extui %23 : vector<16x128xi1> to vector<16x128xi32>
    %25 = arith.sitofp %24 : vector<16x128xi32> to vector<16x128xf32>
    %26 = arith.ori %19, %22 : vector<16x128xi1>
    %27 = arith.extui %26 : vector<16x128xi1> to vector<16x128xi32>
    %28 = arith.sitofp %27 : vector<16x128xi32> to vector<16x128xf32>
    %c0_8 = arith.constant 0 : index
    %c0_9 = arith.constant 0 : index
    %c0_10 = arith.constant 0 : index
    %c0_11 = arith.constant 0 : index
    %29 = vector.load %arg4[%c0_8, %c0_9, %c0_10, %c0_11] : memref<1x2x8x128xf32, #tpu.memory_space<vmem>>, vector<1x1x8x128xf32>
    %30 = vector.shape_cast %29 : vector<1x1x8x128xf32> to vector<8x128xf32>
    %31 = vector.shape_cast %25 : vector<16x128xf32> to vector<2x8x128xf32>
    %cst_12 = arith.constant dense<0.000000e+00> : vector<8x128xf32>
    %32 = vector.multi_reduction <add>, %31, %cst_12 [0] : vector<2x8x128xf32> to vector<8x128xf32>
    %33 = arith.addf %30, %32 : vector<8x128xf32>
    %c0_13 = arith.constant 0 : index
    %c0_14 = arith.constant 0 : index
    %c0_15 = arith.constant 0 : index
    %c0_16 = arith.constant 0 : index
    %34 = vector.load %arg4[%c0_13, %c0_14, %c0_15, %c0_16] : memref<1x2x8x128xf32, #tpu.memory_space<vmem>>, vector<1x1x8x128xf32>
    %35 = vector.shape_cast %34 : vector<1x1x8x128xf32> to vector<8x128xf32>
    %36 = vector.shape_cast %33 : vector<8x128xf32> to vector<1x1x8x128xf32>
    tpu.vector_store %arg4[%c0_13, %c0_14, %c0_15, %c0_16], %36 {strides = array<i32>} : memref<1x2x8x128xf32, #tpu.memory_space<vmem>>, vector<1x1x8x128xf32>,
    %c0_17 = arith.constant 0 : index
    %c1 = arith.constant 1 : index
    %c0_18 = arith.constant 0 : index
    %c0_19 = arith.constant 0 : index
    %37 = vector.load %arg4[%c0_17, %c1, %c0_18, %c0_19] : memref<1x2x8x128xf32, #tpu.memory_space<vmem>>, vector<1x1x8x128xf32>
    %38 = vector.shape_cast %37 : vector<1x1x8x128xf32> to vector<8x128xf32>
    %39 = vector.shape_cast %28 : vector<16x128xf32> to vector<2x8x128xf32>
    %cst_20 = arith.constant dense<0.000000e+00> : vector<8x128xf32>
    %40 = vector.multi_reduction <add>, %39, %cst_20 [0] : vector<2x8x128xf32> to vector<8x128xf32>
    %41 = arith.addf %38, %40 : vector<8x128xf32>
    %c0_21 = arith.constant 0 : index
    %c1_22 = arith.constant 1 : index
    %c0_23 = arith.constant 0 : index
    %c0_24 = arith.constant 0 : index
    %42 = vector.load %arg4[%c0_21, %c1_22, %c0_23, %c0_24] : memref<1x2x8x128xf32, #tpu.memory_space<vmem>>, vector<1x1x8x128xf32>
    %43 = vector.shape_cast %42 : vector<1x1x8x128xf32> to vector<8x128xf32>
    %44 = vector.shape_cast %41 : vector<8x128xf32> to vector<1x1x8x128xf32>
    tpu.vector_store %arg4[%c0_21, %c1_22, %c0_23, %c0_24], %44 {strides = array<i32>} : memref<1x2x8x128xf32, #tpu.memory_space<vmem>>, vector<1x1x8x128xf32>,
    return
  }
  func.func @transform_0(%arg0: i32, %arg1: i32) -> (i32, i32) {
    %c1_i32 = arith.constant 1 : i32
    %0 = arith.muli %arg0, %c1_i32 : i32
    %1 = arith.addi %0, %arg1 : i32
    %c0_i32 = arith.constant 0 : i32
    %2 = arith.minsi %1, %c0_i32 : i32
    %c0_i32_0 = arith.constant 0 : i32
    %c0_i32_1 = arith.constant 0 : i32
    return %2, %c0_i32_0 : i32, i32
  }
  func.func @transform_1(%arg0: i32, %arg1: i32) -> (i32, i32) {
    %c1_i32 = arith.constant 1 : i32
    %0 = arith.muli %arg0, %c1_i32 : i32
    %1 = arith.addi %0, %arg1 : i32
    %c0_i32 = arith.constant 0 : i32
    %2 = arith.minsi %1, %c0_i32 : i32
    %c0_i32_0 = arith.constant 0 : i32
    %c0_i32_1 = arith.constant 0 : i32
    return %2, %c0_i32_0 : i32, i32
  }
  func.func @transform_2(%arg0: i32, %arg1: i32) -> (i32, i32, i32, i32) {
    %c0_i32 = arith.constant 0 : i32
    %c0_i32_0 = arith.constant 0 : i32
    %c0_i32_1 = arith.constant 0 : i32
    %c0_i32_2 = arith.constant 0 : i32
    return %arg0, %c0_i32, %c0_i32_0, %c0_i32_1 : i32, i32, i32, i32
  }
}

</mosaic_0001>

<bundles_post_ra>
// kernel: tpu_custom_call.1
= control target key start
LH: loop header
LB: loop body
LE: loop exit
PB: predicated region body
PF: predicated region fallthrough
CT: control target
= control target key end

     0   :  { %7 = vsyncpa [#allocation3], 0  ;;  %s928_s0 = inlined_call_operand.hbm [shape: f32[16,128], index: 0, kind: input, shape index: {}]   ;;  %s929_s1 = inlined_call_operand.hbm [shape: f32[16,128], index: 1, kind: input, shape index: {}]   ;;  %s930_s2 = inlined_call_operand.hbm [shape: f32[2,2,8,128], index: 2, kind: output, shape index: {}]  }
   0x1   :  { %9 = vsyncpa [#allocation3 + $0x1], 0 }
   0x2   :  { %10 = vsyncpa [#allocation6], 0 }
   0x3   :  { %12 = vsyncpa [#allocation6 + $0x1], 0 }
   0x4   :  { %13 = vsyncpa [#allocation4], 0 }
   0x5   :  { %15 = vsyncpa [#allocation4 + $0x1], 0  ;;  %s737_s9 = smov 0   ;;  %s739_s10 = smov 0  }
   0x6   :  { %s741_s11 = smov 0   ;;  %s743_s12 = smov 0  }
   0x7   :  { %s745_s13 = smov 0   ;;  %s747_s14 = smov 0  }
   0x8   :  { %s749_s15 = smov 0   ;;  %s751_s16 = smov 0  }
   0x9 LB: > { %s421_s17 = sadd.s32 4294967295, %s713_s16   ;;  %s422_s18 = sadd.s32 4294967294, %s713_s16   ;;  %s713_s16 = sphi %s751_s16, %s21_s16   ;;  %s709_s15 = sphi %s749_s15, %s946_s15   ;;  %s705_s14 = sphi %s747_s14, %s945_s14   ;;  %s701_s13 = sphi %s745_s13, %s918_s13   ;;  %s697_s12 = sphi %s743_s12, %s944_s12   ;;  %s693_s11 = sphi %s741_s11, %s943_s11   ;;  %s689_s10 = sphi %s739_s10, %s942_s10   ;;  %s685_s9 = sphi %s737_s9, %s941_s9  }
   0xa   : > { %s33_s19 = sadd.s32 1, %s709_s15  ;;  %p682_p1 = scmp.ne.s32.totalorder %s701_s13, 0 }
   0xb   : > { %p35_p0 = scmp.ge.s32.totalorder %s33_s19, 2  ;;  %p54_p2 = scmp.eq.s32.totalorder %s713_s16, 0 }
   0xc   : > { %p59_p3 = scmp.ne.s32.totalorder %s701_s13, %s697_s12  ;;  %p60_p5 = scmp.eq.s32.totalorder %s421_s17, 0 }
   0xd   : > { %s948_s19 = smov (%p35_p0, %s33_s19), 0  ;;  %p783_p4 = por %p682_p1, %p54_p2 }
   0xe   : > { %p787_p6 = por %p60_p5, %p59_p3  ;;  %s101_s22 = ssub.s32 %s709_s15, %s948_s19 }
   0xf   : > { %p102_p7 = scmp.eq.s32.totalorder %s101_s22, 0  ;;  %s104_s23 = sadd.s32 1, %s693_s11 }
  0x10   : > { %p114_p8 = scmp.ne.s32.totalorder %s693_s11, %s689_s10  ;;  %p115_p9 = scmp.eq.s32.totalorder %s421_s17, 1 }
  0x11   : > { %s795_s24 = scalar_select %p102_p7, %s693_s11, %s104_s23  }
  0x12   : > { %p120_p10 = scmp.ne.s32.totalorder %s689_s10, %s685_s9  ;;  %p121_p11 = scmp.eq.s32.totalorder %s422_s18, 1 }
  0x13   : > { %p801_p12 = por %p115_p9, %p114_p8  ;;  %p424_p13 = scmp.ge.s32.totalorder %s713_s16, 2 }
  0x14   : > { %p806_p0 = por %p121_p11, %p120_p10  ;;  %p467_p1 = scmp.lt.s32.totalorder %s713_s16, 2 }
  0x15   : > { %s154_s29 = sshll.u32 %s928_s0, 4  ;;  %s715_s30 = smov [#allocation2]   ;;  %s155_s29 = int_to_ptr.hbm [resolvable:$true] %s154_s29 }
  0x16   : > { %s156_s3 = sshll.u32 %s715_s30, 4  ;;  %p816_p2 = pnand %p467_p1, %p783_p4  ;;  %s157_s3 = int_to_ptr.vmem [resolvable:$true] %s156_s3 }
  0x17   : > { %p431_p3 = scmp.ge.s32.totalorder %s713_s16, 1  ;;  %p189_p5 = scmp.lt.s32.totalorder %s713_s16, 3 }
  0x18   : > { %s546_s5 = sshra.s32 %s155_s29, 4  ;;  %p550_p8 = pneg %p816_p2  ;;  %s547_s5 = int_to_ptr.hbm [resolvable:$true] %s546_s5 }
  0x19   : > { %s548_s6 = scalar_lea.hbm %s547_s5, 16  ;;  %s553_s12 = scalar_lea.hbm %s928_s0, 16 }
  0x1a   : > { %p549_p7 = scmp.ne.s32.totalorder %s547_s5, %s548_s6  ;;  %p555_p4 = scmp.lt.s32.totalorder %s553_s12, %s548_s6 }
  0x1c   : > { %p551_p9 = pnand %p550_p8, %p549_p7 }
  0x1e   : > { %p552_p10 = pneg %p551_p9 }
  0x20   : > { %p557_p11 = pnand %p555_p4, %p552_p10 }
  0x22   : > { %560 = shalt.err (!%p557_p11)
}
  0x23   : > { %s716_s17 = smov 128   ;;  %s717_s18 = smov 8  }
  0x24   : > { %459 = dma.hbm_to_vmem [thread:$0]  (!%p816_p2), %s155_s29, 256, %s157_s3, [#allocation3], %s716_s17, %s716_s17, %s717_s18  }
  0x25   : > { %p836_p1 = pnand %p431_p3, %p189_p5  ;;  %s179_s27 = sshll.u32 %s929_s1, 4  ;;  %s180_s27 = int_to_ptr.hbm [resolvable:$true] %s179_s27 }
  0x26   : > { %s718_s28 = smov [#allocation5]   ;;  %s576_s5 = sshra.s32 %s180_s27, 4  ;;  %s577_s5 = int_to_ptr.hbm [resolvable:$true] %s576_s5 }
  0x27   : > { %s181_s30 = sshll.u32 %s718_s28, 4  ;;  %s578_s6 = scalar_lea.hbm %s577_s5, 16  ;;  %s182_s30 = int_to_ptr.vmem [resolvable:$true] %s181_s30 }
  0x28   : > { %p579_p7 = scmp.ne.s32.totalorder %s577_s5, %s578_s6  ;;  %s583_s7 = scalar_lea.hbm %s929_s1, 16 }
  0x29   : > { %p585_p3 = scmp.lt.s32.totalorder %s583_s7, %s578_s6 }
  0x2a   : > { %p581_p9 = pnand %p579_p7, %p550_p8 }
  0x2c   : > { %p582_p10 = pneg %p581_p9 }
  0x2e   : > { %p587_p5 = pnand %p585_p3, %p582_p10 }
  0x30   : > { %590 = shalt.err (!%p587_p5)
}
  0x31   : > { %462 = dma.hbm_to_vmem [thread:$0]  (!%p816_p2), %s180_s27, 256, %s182_s30, [#allocation6], %s716_s17, %s716_s17, %s717_s18  }
  0x32   : > { %193 = sbr.rel (%p836_p1) target bundleno = 84 (0x54), region = 28  ;;  %s195_s8 = sand.u32 (!%p836_p1), 1, %s701_s13  }
  0x33   : > { %s432_s12 = sshll.u32 (!%p836_p1), %s195_s8, 4  ;;  %s196_s22 = scalar_lea.sflag (!%p836_p1), [#allocation3], %s195_s8 }
  0x34   : > { %s199_s23 = scalar_lea.vmem (!%p836_p1), [#allocation2], %s432_s12 }
  0x37   : > { %671 = dma.done.wait (%p787_p6), %s196_s22, 256  }
  0x38   : > { %673 = vsyncadd (%p787_p6), %s196_s22, 4294967040  ;;  %s206_s28 = scalar_lea.sflag [#allocation6], %s195_s8  ;;  %s209_s5 = scalar_lea.vmem [#allocation5], %s432_s12 }
  0x39   : > { %675 = dma.done.wait (%p787_p6), %s206_s28, 256  }
  0x3a   : > { %677 = vsyncadd (%p787_p6), %s206_s28, 4294967040  ;;  %p251_p2 = scmp.lt.s32.totalorder %s705_s14, 0  ;;  %v254_v0 = vlaneseq  ;;  %p262_p8 = scmp.lt.s32.totalorder %s705_s14, 1  ;;  %v268_v7 = vld [vmem:[%s199_s23] sm:$0xff]  ;;  %v269_v8 = vld [vmem:[%s199_s23 + $0x8] sm:$0xff]  ;;  %v719_v13 = vmov 0.0  }
  0x3b   : > { %v270_v9 = vld [vmem:[%s209_s5] sm:$0xff]  ;;  %v271_v10 = vld [vmem:[%s209_s5 + $0x8] sm:$0xff]  ;;  %vm272_vm3 = vcmp.ge.f32.partialorder %v268_v7, 0.99  ;;  %s233_s21 = sand.u32 1, %s689_s10   ;;  %s449_s27 = sshll.u32 %s705_s14, 4 }
  0x3c   : > { %v255_v1 = vshrl.u32 %v254_v0, 7  ;;  %s252_s4 = scalar_select %p251_p2, %s705_s14, 0  ;;  %vm273_vm5 = vcmp.ge.f32.partialorder %v269_v8, 0.99  ;;  %vm276_vm7 = vcmp.ge.f32.partialorder %v270_v9, 0.99 }
  0x3d   : > { %s263_s17 = scalar_select %p262_p8, 1, 0  ;;  %vm277_vm9 = vcmp.ge.f32.partialorder %v271_v10, 0.99 }
  0x3e   : > { %v256_v2 = vadd.s32 8, %v255_v1  ;;  %s435_s18 = sshll.u32 %s252_s4, 4  ;;  %s434_s20 = sshll.u32 %s233_s21, 4 }
  0x3f   : > { %v257_v3 = vstv %s435_s18  ;;  %v264_v4 = vstv %s263_s17  ;;  %s313_s29 = scalar_lea.hbm %s930_s2, %s449_s27  ;;  %s235_s14 = scalar_lea.vmem [#allocation7], %s434_s20 }
  0x40   : > { %v258_v5 = vadd.s32 %v257_v3, %v255_v1  ;;  %v259_v6 = vadd.s32 %v257_v3, %v256_v2  ;;  %vm265_vm0 = vcmp.eq.s32.totalorder %v264_v4, 1  ;;  %s314_s3 = sshll.u32 %s235_s14, 4  ;;  %s316_s7 = sshll.u32 %s313_s29, 4  ;;  %s315_s3 = int_to_ptr.vmem [resolvable:$true] %s314_s3  ;;  %s317_s7 = int_to_ptr.hbm [resolvable:$true] %s316_s7 }
  0x41   : > { %s302_s8 = scalar_lea.sflag [#allocation4], %s233_s21  ;;  %s620_s12 = sshra.s32 %s317_s7, 4  ;;  %s621_s12 = int_to_ptr.hbm [resolvable:$true] %s620_s12 }
  0x42   : > { %vm260_vm1 = vcmp.lt.s32.totalorder %v258_v5, 16  ;;  %vm261_vm2 = vcmp.lt.s32.totalorder %v259_v6, 16  ;;  %s622_s22 = scalar_lea.hbm %s621_s12, 16  ;;  %s626_s5 = scalar_lea.hbm %s930_s2, 32 }
  0x43   : > { %vm266_vm4 = vmand %vm260_vm1, %vm265_vm0  ;;  %p623_p6 = scmp.ne.s32.totalorder %s621_s12, %s622_s22  ;;  %p627_p1 = scmp.lt.s32.totalorder %s621_s12, %s930_s2 }
  0x44   : > { %vm267_vm6 = vmand %vm261_vm2, %vm265_vm0  ;;  %p628_p7 = scmp.lt.s32.totalorder %s626_s5, %s622_s22 }
  0x45   : > { %vm866_vm8 = vmand %vm272_vm3, %vm266_vm4  ;;  %p624_p4 = pnand %p623_p6, %p801_p12 }
  0x46   : > { %vm872_vm10 = vmand %vm273_vm5, %vm267_vm6  ;;  %p629_p9 = por %p628_p7, %p627_p1 }
  0x47   : > { %vm278_vm11 = vmand %vm276_vm7, %vm266_vm4  ;;  %p625_p11 = pneg %p624_p4 }
  0x48   : > { %vm279_vm12 = vmand %vm277_vm9, %vm267_vm6 }
  0x49   : > { %vm280_vm13 = vmand %vm866_vm8, %vm278_vm11  ;;  %p630_p10 = pnand %p629_p9, %p625_p11 }
  0x4a   : > { %vm281_vm14 = vmand %vm872_vm10, %vm279_vm12  ;;  %v436_v14 = vsel %vm280_vm13, 1.0, %v719_v13 }
  0x4b   : > { %v437_v15 = vsel %vm281_vm14, 1.0, %v719_v13  ;;  %vm286_vm15 = vmor %vm866_vm8, %vm278_vm11 }
  0x4c   : > { %v293_v16 = vadd.f32 %v437_v15, %v436_v14  ;;  %vm287_vm0 = vmor %vm872_vm10, %vm279_vm12  ;;  %v438_v17 = vsel %vm286_vm15, 1.0, %v719_v13 }
  0x4d   : > { %v439_v18 = vsel %vm287_vm0, 1.0, %v719_v13 }
  0x4e   : > { %v298_v19 = vadd.f32 %v439_v18, %v438_v17  ;;  %295 = vst [vmem:[%s235_s14] sm:$0xff] %v293_v16 }
  0x50   : > { %441 = vst [vmem:[%s235_s14 + $0x8] sm:$0xff] %v298_v19 }
  0x51   : > { %633 = shalt.err (!%p630_p10)
}
  0x52   : > { %s720_s18 = smov 128   ;;  %s721_s21 = smov 8  }
  0x53   : > { %454 = dma.vmem_to_hbm [thread:$0]  (%p801_p12), %s315_s3, 256, %s317_s7, %s302_s8, %s720_s18, %s720_s18, %s721_s21  }
  0x54 PF: > { %s331_s20 = sand.u32 1, %s685_s9   ;;  %p464_p3 = pnand %p424_p13, %p806_p0 }
  0x55   : > { %s332_s27 = scalar_lea.sflag [#allocation4], %s331_s20 }
  0x56   : > { %p465_p5 = pneg %p464_p3 }
  0x58   : > { %679 = dma.done.wait (%p465_p5), %s332_s27, 256  }
  0x59   : > { %681 = vsyncadd (%p465_p5), %s332_s27, 4294967040  ;;  %s21_s16 = sadd.s32 1, %s713_s16   ;;  %s941_s9 = smov %s689_s10 }
  0x5a   : > { %p18_p2 = scmp.ge.s32.totalorder %s21_s16, 4   ;;  %s942_s10 = smov %s693_s11 }
  0x5b   : > { %s943_s11 = smov %s795_s24  ;;  %s944_s12 = smov %s701_s13 }
  0x5c   : > { %s918_s13 = smov 0   ;;  %s945_s14 = smov %s709_s15 }
  0x5d   : > { %s946_s15 = smov %s948_s19  ;;  %20 = sbr.rel (!%p18_p2) target bundleno = 9 (0x9), region = 91 }
  0x62   :  { %338 = vsyncpa [#allocation3], 1 }
  0x63   :  { %340 = vsyncpa [#allocation3 + $0x1], 1 }
  0x64   :  { %341 = vsyncpa [#allocation6], 1 }
  0x65   :  { %343 = vsyncpa [#allocation6 + $0x1], 1 }
  0x66   :  { %344 = vsyncpa [#allocation4], 1 }
  0x67   :  { %346 = vsyncpa [#allocation4 + $0x1], 1 }

</bundles_post_ra>
